<compile_context>
chip_gen: v5e
topology: v5e:2x2
jax: 0.10.0
libtpu: 0.0.40
codegen_flags: <defaults>
</compile_context>

<pallas_src>
import functools
from typing import Dict

import jax
import jax.numpy as jnp
from jax.experimental import pallas as pl
from jax.experimental.pallas import tpu as pltpu

_LANES = 128        # lane-dense last dim (multiple of 128 -> unmasked vst)
_TILE_ROWS = 2048   # rows per block; 6 x 2 x 2048 x 512 B = 12 MiB VMEM


def _second_deriv_kernel(u_p2_ref, u_p1_ref, u_ref, u_m1_ref, u_m2_ref, o_ref,
                         *, c2, c1, c0):
    # Pure elementwise VPU work on the current VMEM tile, f32 accumulation.
    # Factored symmetric coefficients: 3 scalar muls + 4 adds per vreg.
    up2 = u_p2_ref[...].astype(jnp.float32)
    up1 = u_p1_ref[...].astype(jnp.float32)
    u0 = u_ref[...].astype(jnp.float32)
    um1 = u_m1_ref[...].astype(jnp.float32)
    um2 = u_m2_ref[...].astype(jnp.float32)
    o_ref[...] = (c2 * (up2 + um2) + c1 * (up1 + um1) + c0 * u0).astype(o_ref.dtype)


def _sublane_multiple(dtype) -> int:
    # f32 tiles are (8,128); sub-32-bit dtypes pack along sublanes (bf16 -> 16, int8 -> 32).
    return 8 * max(1, 4 // jnp.dtype(dtype).itemsize)


def _flatten_pad(x, rows_padded, lanes):
    flat = x.reshape(-1)
    pad = rows_padded * lanes - flat.size
    if pad:
        flat = jnp.pad(flat, (0, pad))
    return flat.reshape(rows_padded, lanes)


def _second_deriv_fourth_order(u_p2, u_p1, u, u_m1, u_m2, dx: float):
    orig_shape = u.shape
    dtype = u.dtype
    total = u.size
    sub = _sublane_multiple(dtype)

    rows = pl.cdiv(total, _LANES)
    # Tile rows; for small problems the tile shrinks to the (sublane-aligned) row count.
    tile_rows = min(_TILE_ROWS, ((rows + sub - 1) // sub) * sub)
    rows_padded = ((rows + tile_rows - 1) // tile_rows) * tile_rows
    grid = (rows_padded // tile_rows,)

    flats = [_flatten_pad(a, rows_padded, _LANES)
             for a in (u_p2, u_p1, u, u_m1, u_m2)]

    # Stencil coefficients. dx is a Python float (matching the PyTorch forward
    # signature), so they are baked at trace time; a new dx value retraces.
    inv = 1.0 / (dx * dx)
    c2 = -1.0 / 12.0 * inv   # shifts +/-2
    c1 = 4.0 / 3.0 * inv     # shifts +/-1
    c0 = -5.0 / 2.0 * inv    # shift 0

    spec = pl.BlockSpec((tile_rows, _LANES), lambda i: (i, 0))
    kernel = functools.partial(_second_deriv_kernel, c2=c2, c1=c1, c0=c0)

    out_flat = pl.pallas_call(
        kernel,
        out_shape=jax.ShapeDtypeStruct((rows_padded, _LANES), dtype),
        grid_spec=pl.GridSpec(
            grid=grid,
            in_specs=[spec, spec, spec, spec, spec],
            out_specs=spec,
        ),
        compiler_params=pltpu.CompilerParams(
            dimension_semantics=("parallel",),   # megacore sharding on v7x
        ),
    )(*flats)

    return out_flat.reshape(-1)[:total].reshape(orig_shape)


class SecondDerivFourthOrder:
    """JAX/Pallas port of the PyTorch module with identical dict semantics."""

    def __init__(self, var: str, indep_var: str, out_name: str) -> None:
        self.var = var
        self.indep_var = indep_var
        self.out_name = out_name

    def __call__(self, inputs: Dict[str, jnp.ndarray], dx: float) -> Dict[str, jnp.ndarray]:
        u_p2 = inputs[f"{self.var}>>{self.indep_var}::2"]
        u_p1 = inputs[f"{self.var}>>{self.indep_var}::1"]
        u_0 = inputs[f"{self.var}"]
        u_m1 = inputs[f"{self.var}>>{self.indep_var}::-1"]
        u_m2 = inputs[f"{self.var}>>{self.indep_var}::-2"]

        out = _second_deriv_fourth_order(u_p2, u_p1, u_0, u_m1, u_m2, dx)
        return {self.out_name: out}


if __name__ == "__main__":
    key = jax.random.PRNGKey(0)
    N, C, H, W = 2, 4, 16, 16  # NCHW, like the PyTorch conv convention
    dx = 0.1

    keys = jax.random.split(key, 5)
    names = ["u>>x::2", "u>>x::1", "u", "u>>x::-1", "u>>x::-2"]
    inputs = {
        name: jax.random.normal(k, (N, C, H, W), dtype=jnp.float32)
        for name, k in zip(names, keys)
    }

    module = SecondDerivFourthOrder(var="u", indep_var="x", out_name="u__x__x")
    out = module(inputs, dx)["u__x__x"]
    out = jax.block_until_ready(out)

    # Reference check in plain JAX.
    inv = 1.0 / (dx * dx)
    ref = (-1.0 / 12.0 * inv * inputs["u>>x::2"]
           + 4.0 / 3.0 * inv * inputs["u>>x::1"]
           - 5.0 / 2.0 * inv * inputs["u"]
           + 4.0 / 3.0 * inv * inputs["u>>x::-1"]
           - 1.0 / 12.0 * inv * inputs["u>>x::-2"])
    assert out.shape == (N, C, H, W)
    assert jnp.allclose(out, ref, rtol=1e-5, atol=1e-5)

    print("KERNEL_OK")
</pallas_src>

<mosaic_0001>
module attributes {stable_mosaic.version = 11 : i64} {
  func.func @_second_deriv_kernel(%arg0: i32, %arg1: memref<16x128xf32, #tpu.memory_space<vmem>>, %arg2: memref<16x128xf32, #tpu.memory_space<vmem>>, %arg3: memref<16x128xf32, #tpu.memory_space<vmem>>, %arg4: memref<16x128xf32, #tpu.memory_space<vmem>>, %arg5: memref<16x128xf32, #tpu.memory_space<vmem>>, %arg6: memref<16x128xf32, #tpu.memory_space<vmem>>) attributes {dimension_semantics = [#tpu.dimension_semantics<parallel>], iteration_bounds = array<i64: 1>, scalar_prefetch = 0 : i64, scratch_operands = 0 : i64, tpu.core_type = #tpu.core_type<tc>, window_params = [{transform_indices = @transform_0, window_bounds = array<i64: 16, 128>}, {transform_indices = @transform_1, window_bounds = array<i64: 16, 128>}, {transform_indices = @transform_2, window_bounds = array<i64: 16, 128>}, {transform_indices = @transform_3, window_bounds = array<i64: 16, 128>}, {transform_indices = @transform_4, window_bounds = array<i64: 16, 128>}, {transform_indices = @transform_5, window_bounds = array<i64: 16, 128>}]} {
    %c0 = arith.constant 0 : index
    %c0_0 = arith.constant 0 : index
    %0 = vector.load %arg1[%c0, %c0_0] : memref<16x128xf32, #tpu.memory_space<vmem>>, vector<16x128xf32>
    %c0_1 = arith.constant 0 : index
    %c0_2 = arith.constant 0 : index
    %1 = vector.load %arg2[%c0_1, %c0_2] : memref<16x128xf32, #tpu.memory_space<vmem>>, vector<16x128xf32>
    %c0_3 = arith.constant 0 : index
    %c0_4 = arith.constant 0 : index
    %2 = vector.load %arg3[%c0_3, %c0_4] : memref<16x128xf32, #tpu.memory_space<vmem>>, vector<16x128xf32>
    %c0_5 = arith.constant 0 : index
    %c0_6 = arith.constant 0 : index
    %3 = vector.load %arg4[%c0_5, %c0_6] : memref<16x128xf32, #tpu.memory_space<vmem>>, vector<16x128xf32>
    %c0_7 = arith.constant 0 : index
    %c0_8 = arith.constant 0 : index
    %4 = vector.load %arg5[%c0_7, %c0_8] : memref<16x128xf32, #tpu.memory_space<vmem>>, vector<16x128xf32>
    %5 = arith.addf %0, %4 : vector<16x128xf32>
    %cst = arith.constant -8.33333301 : f32
    %6 = vector.broadcast %cst : f32 to vector<16x128xf32>
    %7 = arith.mulf %6, %5 : vector<16x128xf32>
    %8 = arith.addf %1, %3 : vector<16x128xf32>
    %cst_9 = arith.constant 133.333328 : f32
    %9 = vector.broadcast %cst_9 : f32 to vector<16x128xf32>
    %10 = arith.mulf %9, %8 : vector<16x128xf32>
    %11 = arith.addf %7, %10 : vector<16x128xf32>
    %cst_10 = arith.constant -2.500000e+02 : f32
    %12 = vector.broadcast %cst_10 : f32 to vector<16x128xf32>
    %13 = arith.mulf %12, %2 : vector<16x128xf32>
    %14 = arith.addf %11, %13 : vector<16x128xf32>
    %c0_11 = arith.constant 0 : index
    %c0_12 = arith.constant 0 : index
    %15 = vector.load %arg6[%c0_11, %c0_12] : memref<16x128xf32, #tpu.memory_space<vmem>>, vector<16x128xf32>
    tpu.vector_store %arg6[%c0_11, %c0_12], %14 {strides = array<i32>} : memref<16x128xf32, #tpu.memory_space<vmem>>, vector<16x128xf32>,
    return
  }
  func.func @transform_0(%arg0: i32) -> (i32, i32) {
    %c0_i32 = arith.constant 0 : i32
    %c0_i32_0 = arith.constant 0 : i32
    return %arg0, %c0_i32 : i32, i32
  }
  func.func @transform_1(%arg0: i32) -> (i32, i32) {
    %c0_i32 = arith.constant 0 : i32
    %c0_i32_0 = arith.constant 0 : i32
    return %arg0, %c0_i32 : i32, i32
  }
  func.func @transform_2(%arg0: i32) -> (i32, i32) {
    %c0_i32 = arith.constant 0 : i32
    %c0_i32_0 = arith.constant 0 : i32
    return %arg0, %c0_i32 : i32, i32
  }
  func.func @transform_3(%arg0: i32) -> (i32, i32) {
    %c0_i32 = arith.constant 0 : i32
    %c0_i32_0 = arith.constant 0 : i32
    return %arg0, %c0_i32 : i32, i32
  }
  func.func @transform_4(%arg0: i32) -> (i32, i32) {
    %c0_i32 = arith.constant 0 : i32
    %c0_i32_0 = arith.constant 0 : i32
    return %arg0, %c0_i32 : i32, i32
  }
  func.func @transform_5(%arg0: i32) -> (i32, i32) {
    %c0_i32 = arith.constant 0 : i32
    %c0_i32_0 = arith.constant 0 : i32
    return %arg0, %c0_i32 : i32, i32
  }
}

</mosaic_0001>

<bundles_post_ra>
// kernel: tpu_custom_call.1
= control target key start
LH: loop header
LB: loop body
LE: loop exit
PB: predicated region body
PF: predicated region fallthrough
CT: control target
= control target key end

     0   :  { %10 = vsyncpa [#allocation3], 0  ;;  %s380_s0 = inlined_call_operand.hbm [shape: f32[16,128], index: 0, kind: input, shape index: {}]   ;;  %s381_s1 = inlined_call_operand.hbm [shape: f32[16,128], index: 1, kind: input, shape index: {}]   ;;  %s382_s2 = inlined_call_operand.hbm [shape: f32[16,128], index: 2, kind: input, shape index: {}]   ;;  %s383_s3 = inlined_call_operand.hbm [shape: f32[16,128], index: 3, kind: input, shape index: {}]   ;;  %s384_s4 = inlined_call_operand.hbm [shape: f32[16,128], index: 4, kind: input, shape index: {}]   ;;  %s385_s5 = inlined_call_operand.hbm [shape: f32[16,128], index: 5, kind: output, shape index: {}]  }
   0x1   :  { %11 = vsyncpa [#allocation6], 0 }
   0x2   :  { %12 = vsyncpa [#allocation9], 0 }
   0x3   :  { %13 = vsyncpa [#allocation4], 0  ;;  %s31_s20 = sshll.u32 %s381_s1, 4  ;;  %s306_s21 = smov [#allocation5]   ;;  %s32_s20 = int_to_ptr.hbm [resolvable:$true] %s31_s20 }
   0x4   :  { %s33_s22 = sshll.u32 %s306_s21, 4  ;;  %s57_s25 = sshll.u32 %s383_s3, 4  ;;  %s34_s22 = int_to_ptr.vmem [resolvable:$true] %s33_s22  ;;  %s58_s25 = int_to_ptr.hbm [resolvable:$true] %s57_s25 }
   0x5   :  { %s307_s26 = smov 128   ;;  %s308_s27 = smov 8  }
   0x6   :  { %39 = dma.hbm_to_vmem [thread:$0]  %s32_s20, 256, %s34_s22, [#allocation6], %s307_s26, %s307_s26, %s308_s27  }
   0x7   :  { %s309_s28 = smov [#allocation8]   ;;  %s18_s1 = sshll.u32 %s380_s0, 4  ;;  %s19_s1 = int_to_ptr.hbm [resolvable:$true] %s18_s1 }
   0x8   :  { %s59_s29 = sshll.u32 %s309_s28, 4  ;;  %s44_s8 = sshll.u32 %s382_s2, 4  ;;  %s60_s29 = int_to_ptr.vmem [resolvable:$true] %s59_s29  ;;  %s45_s8 = int_to_ptr.hbm [resolvable:$true] %s44_s8 }
   0x9   :  { %65 = dma.hbm_to_vmem [thread:$0]  %s58_s25, 256, %s60_s29, [#allocation9], %s307_s26, %s307_s26, %s308_s27  }
   0xa   :  { %s310_s9 = smov [#allocation2]   ;;  %s311_s11 = smov [#allocation7]  }
   0xb   :  { %s20_s10 = sshll.u32 %s310_s9, 4  ;;  %s46_s0 = sshll.u32 %s311_s11, 4  ;;  %s21_s10 = int_to_ptr.vmem [resolvable:$true] %s20_s10  ;;  %s47_s0 = int_to_ptr.vmem [resolvable:$true] %s46_s0 }
   0xc   :  { %26 = dma.hbm_to_vmem [thread:$0]  %s19_s1, 256, %s21_s10, [#allocation3], %s307_s26, %s307_s26, %s308_s27  }
   0xd   :  { %s70_s14 = sshll.u32 %s384_s4, 4  ;;  %s312_s2 = smov [#allocation10]   ;;  %s71_s14 = int_to_ptr.hbm [resolvable:$true] %s70_s14 }
   0xe   :  { %52 = dma.hbm_to_vmem [thread:$0]  %s45_s8, 256, %s47_s0, [#allocation6], %s307_s26, %s307_s26, %s308_s27  }
   0xf   :  { %s72_s15 = sshll.u32 %s312_s2, 4  ;;  %s73_s15 = int_to_ptr.vmem [resolvable:$true] %s72_s15 }
  0x10   :  { %78 = dma.hbm_to_vmem [thread:$0]  %s71_s14, 256, %s73_s15, [#allocation9], %s307_s26, %s307_s26, %s308_s27  }
  0x11   :  { %298 = dma.done.wait [#allocation3], 256  }
  0x12   :  { %299 = vsyncadd [#allocation3], 4294967040 }
  0x13   :  { %300 = dma.done.wait [#allocation6], 512  }
  0x14   :  { %301 = vsyncadd [#allocation6], 4294966784 }
  0x15   :  { %302 = dma.done.wait [#allocation9], 512  }
  0x16   :  { %303 = vsyncadd [#allocation9], 4294966784  ;;  %v99_v0 = vld [vmem:[#allocation2] sm:$0xff]  ;;  %v101_v1 = vld [vmem:[#allocation5] sm:$0xff]  ;;  %s313_s4 = smov [#allocation11]   ;;  %s131_s19 = sshll.u32 %s385_s5, 4  ;;  %s132_s19 = int_to_ptr.hbm [resolvable:$true] %s131_s19 }
  0x17   :  { %v103_v2 = vld [vmem:[#allocation7] sm:$0xff]  ;;  %v105_v3 = vld [vmem:[#allocation8] sm:$0xff]  ;;  %v100_v5 = vld [vmem:[#allocation2 + $0x8] sm:$0xff]  ;;  %s129_s16 = sshll.u32 %s313_s4, 4  ;;  %s130_s16 = int_to_ptr.vmem [resolvable:$true] %s129_s16 }
  0x18   :  { %v107_v4 = vld [vmem:[#allocation10] sm:$0xff]  ;;  %v113_v7 = vadd.f32 %v105_v3, %v101_v1  ;;  %v102_v8 = vld [vmem:[#allocation5 + $0x8] sm:$0xff]  ;;  %v104_v10 = vld [vmem:[#allocation7 + $0x8] sm:$0xff]  ;;  %v119_v15 = vmul.f32 -250.0, %v103_v2 }
  0x19   :  { %v109_v6 = vadd.f32 %v107_v4, %v99_v0  ;;  %v106_v9 = vld [vmem:[#allocation8 + $0x8] sm:$0xff]  ;;  %v108_v11 = vld [vmem:[#allocation10 + $0x8] sm:$0xff]  ;;  %v120_v20 = vmul.f32 -250.0, %v104_v10 }
  0x1a   :  { %v114_v12 = vadd.f32 %v106_v9, %v102_v8  ;;  %v115_v14 = vmul.f32 133.33333, %v113_v7  ;;  %v110_v16 = vadd.f32 %v108_v11, %v100_v5 }
  0x1b   :  { %v111_v13 = vmul.f32 -8.333333, %v109_v6 }
  0x1c   :  { %v116_v17 = vmul.f32 133.33333, %v114_v12  ;;  %v112_v19 = vmul.f32 -8.333333, %v110_v16 }
  0x1d   :  { %v117_v18 = vadd.f32 %v115_v14, %v111_v13 }
  0x1e   :  { %v118_v22 = vadd.f32 %v116_v17, %v112_v19 }
  0x1f   :  { %v121_v21 = vadd.f32 %v119_v15, %v117_v18 }
  0x20   :  { %v122_v23 = vadd.f32 %v120_v20, %v118_v22 }
  0x21   :  { %123 = vst [vmem:[#allocation11] sm:$0xff] %v121_v21 }
  0x22   :  { %124 = vst [vmem:[#allocation11 + $0x8] sm:$0xff] %v122_v23 }
  0x23   :  { %137 = dma.vmem_to_hbm [thread:$0]  %s130_s16, 256, %s132_s19, [#allocation4], %s307_s26, %s307_s26, %s308_s27  }
  0x24   :  { %304 = dma.done.wait [#allocation4], 256  }
  0x25   :  { %305 = vsyncadd [#allocation4], 4294967040 }
  0x26   :  { %142 = vsyncpa [#allocation3], 1 }
  0x27   :  { %143 = vsyncpa [#allocation6], 1 }
  0x28   :  { %144 = vsyncpa [#allocation9], 1 }
  0x29   :  { %145 = vsyncpa [#allocation4], 1 }

</bundles_post_ra>
